<compile_context>
chip_gen: v7x
topology: tpu7x:2x2x1
jax: 0.10.0
libtpu: 0.0.40
codegen_flags: <defaults>
</compile_context>

<pallas_src>
import jax
import jax.numpy as jnp
from jax.experimental import pallas as pl
from jax.experimental.pallas import tpu as pltpu

_TN_CAP = 2048  # out-feature tile cap (multiple of 128); keeps VMEM at a few MiB


def _round_up(x, m):
    return ((x + m - 1) // m) * m


def _split_dim(size, align, cap):
    """Split `size` into n equal tiles (tile % align == 0, tile <= cap) with
    minimal padding. Returns (tile, padded_size, n_tiles)."""
    size_a = _round_up(size, align)
    n = pl.cdiv(size_a, cap)
    tile = _round_up(pl.cdiv(size_a, n), align)
    return tile, tile * n, n


def _device_caps():
    """(tm_cap, has_two_tensorcores) derived from the attached TPU generation."""
    try:
        kind = jax.devices()[0].device_kind.lower()
    except Exception:
        kind = ""
    # v6e / v7x MXUs are 256-wide -> TM up to 256; v5e (128-wide) keeps 128.
    newer = ("v6" in kind) or ("v7" in kind) or ("7x" in kind)
    tm_cap = 256 if newer else 128
    two_cores = ("v7" in kind) or ("7x" in kind)
    return tm_cap, two_cores


def _cde_func_kernel(z_ref, w1_ref, b1_ref, w2_ref, b2_ref, o_ref):
    # z arrives f32; the bf16 cast is a free VPU op hidden under the DMA.
    z = z_ref[...].astype(jnp.bfloat16)
    h = jnp.dot(z, w1_ref[...], preferred_element_type=jnp.float32)     # MXU
    h = jnp.maximum(h + b1_ref[...], 0.0)                               # VPU, f32
    out = jnp.dot(h.astype(jnp.bfloat16), w2_ref[...],
                  preferred_element_type=jnp.float32)                   # MXU
    o_ref[...] = (out + b2_ref[...]).astype(o_ref.dtype)


def init_params(key, input_channels, hidden_channels):
    """torch.nn.Linear-style init; raw f32 params (cast/pad in prepare_params)."""
    k1, k2, k3, k4 = jax.random.split(key, 4)
    out_feat = input_channels * hidden_channels

    bound1 = 1.0 / jnp.sqrt(jnp.float32(hidden_channels))
    w1 = jax.random.uniform(k1, (hidden_channels, 128), jnp.float32,
                            minval=-bound1, maxval=bound1)
    b1 = jax.random.uniform(k2, (128,), jnp.float32,
                            minval=-bound1, maxval=bound1)

    bound2 = 1.0 / jnp.sqrt(jnp.float32(128.0))
    w2 = jax.random.uniform(k3, (128, out_feat), jnp.float32,
                            minval=-bound2, maxval=bound2)
    b2 = jax.random.uniform(k4, (out_feat,), jnp.float32,
                            minval=-bound2, maxval=bound2)

    # self.W = Parameter(ones(input_channels)) — unused in forward, kept for parity.
    W = jnp.ones((input_channels,), jnp.float32)
    return {"w1": w1, "b1": b1, "w2": w2, "b2": b2, "W": W}


def prepare_params(params, *, input_channels, hidden_channels):
    """One-time param prep (call OUTSIDE the ODE loop): cast weights to bf16 and
    pre-pad w2/b2 to the lane-aligned out-feature width so the forward does no
    per-call pad / cast of the large arrays."""
    out_feat = input_channels * hidden_channels
    _, out_feat_p, _ = _split_dim(out_feat, 128, _TN_CAP)

    w1 = jnp.asarray(params["w1"]).astype(jnp.bfloat16)
    b1 = jnp.asarray(params["b1"], jnp.float32).reshape(1, -1)
    w2 = jnp.asarray(params["w2"]).astype(jnp.bfloat16)
    b2 = jnp.asarray(params["b2"], jnp.float32).reshape(1, -1)
    # TODO(synk): on v7x, w2 could be stored as fp8 (e4m3) with a folded scale to
    # halve the dominant DMA stream; kept bf16 here for cross-generation parity.
    if out_feat_p != out_feat:
        w2 = jnp.pad(w2, ((0, 0), (0, out_feat_p - out_feat)))
        b2 = jnp.pad(b2, ((0, 0), (0, out_feat_p - out_feat)))
    return {"w1": w1, "b1": b1, "w2": w2, "b2": b2, "W": params.get("W")}


def cde_func_forward(t, z, params, *, input_channels, hidden_channels):
    """Pallas implementation of CDEFunc.forward.

    z may have any leading dims (..., hidden_channels); they are folded into the
    kernel's batch axis so a single pallas_call amortizes launch overhead across
    ODE stages / time points. Returns (..., hidden_channels, input_channels).
    """
    del t  # unused, as in the PyTorch module
    hidden = hidden_channels
    out_feat = input_channels * hidden_channels

    lead = z.shape[:-1]
    z2 = z.reshape(-1, hidden)
    batch = z2.shape[0]

    tm_cap, two_cores = _device_caps()
    TM, batch_p, n_i = _split_dim(batch, 8, tm_cap)        # pad-minimizing TM
    TN, out_feat_p, n_j = _split_dim(out_feat, 128, _TN_CAP)

    w1, b1, w2, b2 = params["w1"], params["b1"], params["w2"], params["b2"]
    if (w2.ndim != 2 or w2.shape[-1] != out_feat_p
            or w2.dtype != jnp.bfloat16 or b2.ndim != 2):
        # Fallback path: prep on the fly (prefer prepare_params() once, outside
        # the solver loop).
        p = prepare_params(params, input_channels=input_channels,
                           hidden_channels=hidden_channels)
        w1, b1, w2, b2 = p["w1"], p["b1"], p["w2"], p["b2"]

    # v7x: give the second TensorCore work when the grid would be (1,1) and one
    # half-tile's MXU time still exceeds the ~0.35us per-step overhead.
    if two_cores and n_i == 1 and n_j == 1:
        per_half_flops = batch_p * 128 * out_feat_p   # layer-2 MACs per half
        if per_half_flops >= 3e8:
            if out_feat_p % 256 == 0:
                TN, n_j = out_feat_p // 2, 2
            elif TM % 16 == 0:
                TM, n_i = TM // 2, 2

    # z is the only array padded per call; it is tiny (batch x hidden f32).
    z_pad = z2 if batch_p == batch else jnp.pad(z2, ((0, batch_p - batch), (0, 0)))

    # Advisory cost matching the batch-inner grid ordering (w2 streamed once,
    # z re-read once per feature tile) so XLA overlaps this kernel aggressively.
    cost = pl.CostEstimate(
        flops=int(2 * batch_p * hidden * 128 * n_j
                  + 2 * batch_p * 128 * out_feat_p),
        transcendentals=0,
        bytes_accessed=int(batch_p * hidden * 4 * n_j       # z, per feature tile
                           + w1.size * 2 + b1.size * 4      # pinned layer-1 params
                           + w2.size * 2 + b2.size * 4      # streamed exactly once
                           + batch_p * out_feat_p * 4),     # output
    )

    out_flat = pl.pallas_call(
        _cde_func_kernel,
        out_shape=jax.ShapeDtypeStruct((batch_p, out_feat_p), jnp.float32),
        # Grid = (feature tiles, batch tiles): batch is the inner (fastest)
        # axis, so the w2/b2 block index is constant across consecutive steps
        # and w2 — the dominant HBM stream — stays VMEM-resident.
        grid=(n_j, n_i),
        in_specs=[
            pl.BlockSpec((TM, hidden), lambda j, i: (i, 0)),    # activations (f32)
            pl.BlockSpec((hidden, 128), lambda j, i: (0, 0)),   # w1 (pinned)
            pl.BlockSpec((1, 128), lambda j, i: (0, 0)),        # b1 (pinned)
            pl.BlockSpec((128, TN), lambda j, i: (0, j)),       # w2 (per feat tile)
            pl.BlockSpec((1, TN), lambda j, i: (0, j)),         # b2 (per feat tile)
        ],
        out_specs=pl.BlockSpec((TM, TN), lambda j, i: (i, j)),
        compiler_params=pltpu.CompilerParams(
            dimension_semantics=("parallel", "parallel")),
        cost_estimate=cost,
    )(z_pad, w1, b1, w2, b2)

    # Strip padding; the lane-sparse view to (..., hidden, input_channels) is the
    # module's contract and stays a wrapper-side reshape (keep it off the kernel).
    out_flat = out_flat[:batch, :out_feat]
    return out_flat.reshape(*lead, hidden_channels, input_channels)


if __name__ == "__main__":
    input_channels = 4
    hidden_channels = 32
    batch = 2

    key = jax.random.PRNGKey(0)
    pkey, zkey = jax.random.split(key)
    raw_params = init_params(pkey, input_channels, hidden_channels)
    params = prepare_params(raw_params, input_channels=input_channels,
                            hidden_channels=hidden_channels)

    z = jax.random.normal(zkey, (batch, hidden_channels), jnp.float32)
    t = jnp.float32(0.0)

    out = cde_func_forward(t, z, params,
                           input_channels=input_channels,
                           hidden_channels=hidden_channels)
    out = jax.block_until_ready(out)

    # Reference in plain JAX with the same cast chain (bf16 weights, f32 accum).
    out_feat = input_channels * hidden_channels
    h = jnp.dot(z.astype(jnp.bfloat16), params["w1"],
                preferred_element_type=jnp.float32)
    h = jnp.maximum(h + params["b1"], 0.0)
    ref = (jnp.dot(h.astype(jnp.bfloat16), params["w2"][:, :out_feat],
                   preferred_element_type=jnp.float32)
           + params["b2"][:, :out_feat])
    ref = ref.reshape(batch, hidden_channels, input_channels)

    assert out.shape == (batch, hidden_channels, input_channels)
    assert jnp.allclose(out, ref, atol=1e-2, rtol=1e-2)

    # Folded leading dims (ODE stages x batch) go through one pallas_call.
    zs = jax.random.normal(jax.random.PRNGKey(1),
                           (3, batch, hidden_channels), jnp.float32)
    outs = jax.block_until_ready(
        cde_func_forward(t, zs, params, input_channels=input_channels,
                         hidden_channels=hidden_channels))
    assert outs.shape == (3, batch, hidden_channels, input_channels)

    print("KERNEL_OK")
</pallas_src>

<mosaic_0001>
module attributes {stable_mosaic.version = 11 : i64} {
  func.func @_cde_func_kernel(%arg0: i32, %arg1: i32, %arg2: memref<8x32xf32, #tpu.memory_space<vmem>>, %arg3: memref<32x128xbf16, #tpu.memory_space<vmem>>, %arg4: memref<1x128xf32, #tpu.memory_space<vmem>>, %arg5: memref<128x128xbf16, #tpu.memory_space<vmem>>, %arg6: memref<1x128xf32, #tpu.memory_space<vmem>>, %arg7: memref<8x128xf32, #tpu.memory_space<vmem>>) attributes {dimension_semantics = [#tpu.dimension_semantics<parallel>, #tpu.dimension_semantics<parallel>], iteration_bounds = array<i64: 1, 1>, scalar_prefetch = 0 : i64, scratch_operands = 0 : i64, tpu.core_type = #tpu.core_type<tc>, window_params = [{transform_indices = @transform_0, window_bounds = array<i64: 8, 32>}, {pipeline_mode = #tpu.pipeline_mode<synchronous>, transform_indices = @transform_1, window_bounds = array<i64: 32, 128>}, {pipeline_mode = #tpu.pipeline_mode<synchronous>, transform_indices = @transform_2, window_bounds = array<i64: 1, 128>}, {transform_indices = @transform_3, window_bounds = array<i64: 128, 128>}, {transform_indices = @transform_4, window_bounds = array<i64: 1, 128>}, {transform_indices = @transform_5, window_bounds = array<i64: 8, 128>}]} {
    %c0 = arith.constant 0 : index
    %c0_0 = arith.constant 0 : index
    %0 = vector.load %arg2[%c0, %c0_0] : memref<8x32xf32, #tpu.memory_space<vmem>>, vector<8x32xf32>
    %1 = arith.truncf %0 : vector<8x32xf32> to vector<8x32xbf16>
    %c0_1 = arith.constant 0 : index
    %c0_2 = arith.constant 0 : index
    %2 = vector.load %arg3[%c0_1, %c0_2] : memref<32x128xbf16, #tpu.memory_space<vmem>>, vector<32x128xbf16>
    %cst = arith.constant dense<0.000000e+00> : vector<8x128xf32>
    %3 = tpu.matmul %1, %2, %cst {dimension_numbers = #tpu.dot_dimension_numbers<[1], [0], [0], [1], [0, 0, 1, 1], [], []>} : vector<8x32xbf16>, vector<32x128xbf16>, vector<8x128xf32> -> vector<8x128xf32>
    %c0_3 = arith.constant 0 : index
    %c0_4 = arith.constant 0 : index
    %4 = vector.load %arg4[%c0_3, %c0_4] : memref<1x128xf32, #tpu.memory_space<vmem>>, vector<1x128xf32>
    %5 = vector.broadcast %4 : vector<1x128xf32> to vector<8x128xf32>
    %6 = arith.addf %3, %5 : vector<8x128xf32>
    %cst_5 = arith.constant 0.000000e+00 : f32
    %7 = vector.broadcast %cst_5 : f32 to vector<8x128xf32>
    %8 = arith.maximumf %6, %7 : vector<8x128xf32>
    %9 = arith.truncf %8 : vector<8x128xf32> to vector<8x128xbf16>
    %c0_6 = arith.constant 0 : index
    %c0_7 = arith.constant 0 : index
    %10 = vector.load %arg5[%c0_6, %c0_7] : memref<128x128xbf16, #tpu.memory_space<vmem>>, vector<128x128xbf16>
    %cst_8 = arith.constant dense<0.000000e+00> : vector<8x128xf32>
    %11 = tpu.matmul %9, %10, %cst_8 {dimension_numbers = #tpu.dot_dimension_numbers<[1], [0], [0], [1], [0, 0, 1, 1], [], []>} : vector<8x128xbf16>, vector<128x128xbf16>, vector<8x128xf32> -> vector<8x128xf32>
    %c0_9 = arith.constant 0 : index
    %c0_10 = arith.constant 0 : index
    %12 = vector.load %arg6[%c0_9, %c0_10] : memref<1x128xf32, #tpu.memory_space<vmem>>, vector<1x128xf32>
    %13 = vector.broadcast %12 : vector<1x128xf32> to vector<8x128xf32>
    %14 = arith.addf %11, %13 : vector<8x128xf32>
    %c0_11 = arith.constant 0 : index
    %c0_12 = arith.constant 0 : index
    %15 = vector.load %arg7[%c0_11, %c0_12] : memref<8x128xf32, #tpu.memory_space<vmem>>, vector<8x128xf32>
    tpu.vector_store %arg7[%c0_11, %c0_12], %14 {strides = array<i32>} : memref<8x128xf32, #tpu.memory_space<vmem>>, vector<8x128xf32>,
    return
  }
  func.func @transform_0(%arg0: i32, %arg1: i32) -> (i32, i32) {
    %c0_i32 = arith.constant 0 : i32
    %c0_i32_0 = arith.constant 0 : i32
    return %arg1, %c0_i32 : i32, i32
  }
  func.func @transform_1(%arg0: i32, %arg1: i32) -> (i32, i32) {
    %c0_i32 = arith.constant 0 : i32
    %c0_i32_0 = arith.constant 0 : i32
    %c0_i32_1 = arith.constant 0 : i32
    return %c0_i32, %c0_i32_0 : i32, i32
  }
  func.func @transform_2(%arg0: i32, %arg1: i32) -> (i32, i32) {
    %c0_i32 = arith.constant 0 : i32
    %c0_i32_0 = arith.constant 0 : i32
    %c0_i32_1 = arith.constant 0 : i32
    return %c0_i32, %c0_i32_0 : i32, i32
  }
  func.func @transform_3(%arg0: i32, %arg1: i32) -> (i32, i32) {
    %c0_i32 = arith.constant 0 : i32
    %c0_i32_0 = arith.constant 0 : i32
    return %c0_i32, %arg0 : i32, i32
  }
  func.func @transform_4(%arg0: i32, %arg1: i32) -> (i32, i32) {
    %c0_i32 = arith.constant 0 : i32
    %c0_i32_0 = arith.constant 0 : i32
    return %c0_i32, %arg0 : i32, i32
  }
  func.func @transform_5(%arg0: i32, %arg1: i32) -> (i32, i32) {
    %c0_i32 = arith.constant 0 : i32
    return %arg1, %arg0 : i32, i32
  }
}

</mosaic_0001>

<bundles_post_ra>
// kernel: tpu_custom_call.1
= control target key start
LH: loop header
LB: loop body
LE: loop exit
PB: predicated region body
PF: predicated region fallthrough
CT: control target
= control target key end

     0   :  { %10 = vsyncpa [#allocation3], 0  ;;  %s523_s0 = inlined_call_operand.hbm [shape: f32[8,32], index: 0, kind: input, shape index: {}]   ;;  %s524_s1 = inlined_call_operand.hbm [shape: bf16[32,128], index: 1, kind: input, shape index: {}]   ;;  %s525_s2 = inlined_call_operand.vmem [shape: f32[1,128], index: 2, kind: input, shape index: {}]   ;;  %s526_s3 = inlined_call_operand.hbm [shape: bf16[128,128], index: 3, kind: input, shape index: {}]   ;;  %s527_s4 = inlined_call_operand.vmem [shape: f32[1,128], index: 4, kind: input, shape index: {}]   ;;  %s528_s5 = inlined_call_operand.hbm [shape: f32[8,128], index: 5, kind: output, shape index: {}]  }
   0x1   :  { %11 = vsyncpa [#allocation6], 0 }
   0x2   :  { %12 = vsyncpa [#allocation4], 0  ;;  %s425_s18 = smov [#allocation5]   ;;  %s331_s22 = scalar_lea.hbm %s524_s1, 256 }
   0x3   :  { %s28_s19 = sshll.u32 %s425_s18, 4  ;;  %p332_p0 = scmp.ne.s32.totalorder %s524_s1, %s331_s22  ;;  %s29_s19 = int_to_ptr.vmem [resolvable:$true] %s28_s19 }
   0x4   :  { %p335_p1 = scmp.lt.u32.totalorder %s331_s22, %s524_s1 }
   0x6   :  { %p337_p2 = pnand %p335_p1, %p332_p0 }
   0x8   :  { %340 = shalt.err (!%p337_p2)
}
   0x9   :  { %s341_s27 = scalar_lea.vmem %s29_s19, 256  ;;  %p346_p4 = scmp.lt.s32.totalorder %s29_s19, %s29_s19 }
   0xa   :  { %p342_p3 = scmp.ne.s32.totalorder %s29_s19, %s341_s27  ;;  %p347_p5 = scmp.lt.s32.totalorder %s341_s27, %s341_s27 }
   0xc   :  { %p348_p6 = por %p347_p5, %p346_p4 }
   0xe   :  { %p349_p7 = pnand %p348_p6, %p342_p3 }
  0x10   :  { %352 = shalt.err (!%p349_p7)
}
  0x11   :  { %s426_s28 = smov 64   ;;  %s427_s29 = smov 4  }
  0x12   :  { %34 = dma.hbm_to_vmem [thread:$0]  %s524_s1, 256, %s29_s19, [#allocation6], %s426_s28, %s426_s28, %s427_s29  }
  0x13   :  { %s428_s7 = smov [#allocation2]   ;;  %s429_s9 = smov [#allocation7]  }
  0x14   :  { %s19_s8 = sshll.u32 %s428_s7, 4  ;;  %s42_s10 = sshll.u32 %s429_s9, 4  ;;  %s20_s8 = int_to_ptr.vmem [resolvable:$true] %s19_s8  ;;  %s43_s10 = int_to_ptr.vmem [resolvable:$true] %s42_s10 }
  0x15   :  { %s353_s13 = scalar_lea.hbm %s523_s0, 128 }
  0x16   :  { %p354_p8 = scmp.ne.s32.totalorder %s523_s0, %s353_s13  ;;  %p357_p9 = scmp.lt.u32.totalorder %s353_s13, %s523_s0 }
  0x18   :  { %p359_p10 = pnand %p357_p9, %p354_p8 }
  0x1a   :  { %362 = shalt.err (!%p359_p10)
}
  0x1b   :  { %s363_s1 = scalar_lea.vmem %s20_s8, 128  ;;  %p368_p12 = scmp.lt.s32.totalorder %s20_s8, %s20_s8 }
  0x1c   :  { %p364_p11 = scmp.ne.s32.totalorder %s20_s8, %s363_s1  ;;  %p369_p13 = scmp.lt.s32.totalorder %s363_s1, %s363_s1 }
  0x1e   :  { %p370_p0 = por %p369_p13, %p368_p12 }
  0x20   :  { %p371_p1 = pnand %p370_p0, %p364_p11 }
  0x22   :  { %374 = shalt.err (!%p371_p1)
}
  0x23   :  { %22 = dma.hbm_to_vmem [thread:$0]  %s523_s0, 128, %s20_s8, [#allocation3]  }
  0x24   :  { %s375_s22 = scalar_lea.hbm %s526_s3, 1024 }
  0x25   :  { %p376_p2 = scmp.ne.s32.totalorder %s526_s3, %s375_s22  ;;  %p379_p3 = scmp.lt.u32.totalorder %s375_s22, %s526_s3 }
  0x27   :  { %p381_p4 = pnand %p379_p3, %p376_p2 }
  0x29   :  { %384 = shalt.err (!%p381_p4)
}
  0x2a   :  { %s385_s27 = scalar_lea.vmem %s43_s10, 1024  ;;  %p390_p6 = scmp.lt.s32.totalorder %s43_s10, %s43_s10 }
  0x2b   :  { %p386_p5 = scmp.ne.s32.totalorder %s43_s10, %s385_s27  ;;  %p391_p7 = scmp.lt.s32.totalorder %s385_s27, %s385_s27 }
  0x2d   :  { %p392_p8 = por %p391_p7, %p390_p6 }
  0x2f   :  { %p393_p9 = pnand %p392_p8, %p386_p5 }
  0x31   :  { %396 = shalt.err (!%p393_p9)
}
  0x32   :  { %48 = dma.hbm_to_vmem [thread:$0]  %s526_s3, 1024, %s43_s10, [#allocation6], %s426_s28, %s426_s28, %s427_s29  }
  0x33   :  { %419 = dma.done.wait [#allocation3], 128  }
  0x34   :  { %420 = vsyncadd [#allocation3], 4294967168 }
  0x35   :  { %421 = dma.done.wait [#allocation6], 1280  }
  0x36   :  { %422 = vsyncadd [#allocation6], 4294966016  ;;  %v430_v0 = vmov 0.0   ;;  %vm431_vm0 = vmmov 0   ;;  %v321_v1 = vld [vmem:[#allocation5] sm:$0xff]   ;;  %v322_v2 = vld [vmem:[#allocation5 + $0x8] sm:$0xff]  }
  0x37   :  { %285 = vmatprep.subr.bf16.mxu0 %v430_v0  ;;  %289 = vmatprep.mubr.msk.bf16.mxu0 %vm431_vm0, %v430_v0  ;;  %v61_v3 = vld [vmem:[#allocation2] sm:$0xff]  ;;  %v323_v4 = vld [vmem:[#allocation7] sm:$0xff]   ;;  %vm86_vm1 = vcmask 261120   ;;  %v325_v7 = vld [vmem:[#allocation7 + $0x10] sm:$0xff]   ;;  %s432_s7 = smov [#allocation8]  }
  0x38   :  { %293 = vmatprep.subr.bf16.mxu1 %v430_v0  ;;  %309 = vmatprep.mubr.msk.bf16.mxu1 %vm431_vm0, %v430_v0  ;;  %v62_v5 = vpack.c.bf16 %v61_v3, %v61_v3  ;;  %v324_v6 = vld [vmem:[#allocation7 + $0x8] sm:$0xff]   ;;  %v326_v8 = vld [vmem:[#allocation7 + $0x18] sm:$0xff]   ;;  %v327_v9 = vld [vmem:[#allocation7 + $0x20] sm:$0xff]   ;;  %s250_s8 = sshll.u32 %s432_s7, 4  ;;  %s251_s8 = int_to_ptr.vmem [resolvable:$true] %s250_s8 }
  0x39   :  { %286 = vmatpush3.bf16.msra.mxu0 %v321_v1  ;;  %294 = vmatpush3.bf16.msra.mxu1 %v323_v4  ;;  %v328_v10 = vld [vmem:[#allocation7 + $0x28] sm:$0xff]   ;;  %v329_v11 = vld [vmem:[#allocation7 + $0x30] sm:$0xff]   ;;  %v330_v12 = vld [vmem:[#allocation7 + $0x38] sm:$0xff]   ;;  %p402_p11 = scmp.lt.s32.totalorder %s251_s8, %s251_s8 }
  0x3a   :  { %287 = vmatprep.subr.bf16.mxu0 %v430_v0  ;;  %295 = vmatprep.subr.bf16.mxu1 %v430_v0  ;;  %v260_v13 = vld [vmem:[%s525_s2] ss:$0 sm:$0xff]  ;;  %s397_s2 = scalar_lea.vmem %s251_s8, 128 }
  0x3b   :  { %v264_v21 = vld [vmem:[%s527_s4] ss:$0 sm:$0xff]  ;;  %p398_p10 = scmp.ne.s32.totalorder %s251_s8, %s397_s2  ;;  %p403_p12 = scmp.lt.s32.totalorder %s397_s2, %s397_s2 }
  0x3d   :  { %288 = vmatpush3.bf16.msra.mxu0 %v322_v2  ;;  %296 = vmatpush3.bf16.msra.mxu1 %v324_v6  ;;  %p404_p13 = por %p403_p12, %p402_p11 }
  0x3e   :  { %297 = vmatprep.subr.bf16.mxu1 %v430_v0 }
  0x3f   :  { %p405_p0 = pnand %p404_p13, %p398_p10 }
  0x40   :  { %290 = vmatmul.mubr.msk.bf16.vlgmr.msra.gmra.mrb[0].mxu0 %vm86_vm1, %v62_v5 }
  0x41   :  { %298 = vmatpush3.bf16.msra.mxu1 %v325_v7 }
  0x42   :  { %299 = vmatprep.subr.bf16.mxu1 %v430_v0 }
  0x45   :  { %300 = vmatpush3.bf16.msra.mxu1 %v326_v8 }
  0x46   :  { %301 = vmatprep.subr.bf16.mxu1 %v430_v0 }
  0x49   :  { %302 = vmatpush3.bf16.msra.mxu1 %v327_v9 }
  0x4a   :  { %303 = vmatprep.subr.bf16.mxu1 %v430_v0 }
  0x4d   :  { %304 = vmatpush3.bf16.msra.mxu1 %v328_v10 }
  0x4e   :  { %305 = vmatprep.subr.bf16.mxu1 %v430_v0 }
  0x51   :  { %306 = vmatpush3.bf16.msra.mxu1 %v329_v11 }
  0x52   :  { %307 = vmatprep.subr.bf16.mxu1 %v430_v0 }
  0x55   :  { %308 = vmatpush3.bf16.msra.mxu1 %v330_v12 }
 0x113   :  { %v124_v14 = vpop.f32.mrb[0].mxu0 }
 0x114   :  { %v125_v15 = vadd.f32 %v260_v13, %v124_v14  ;;  %v291_v16 = vpop.f32.mrb[1].mxu0 }
 0x115   :  { %v127_v17 = vpop.f32.mrb[2].mxu0 }
 0x116   :  { %v130_v18 = vmax.f32 %v125_v15, 0.0  ;;  %v292_v19 = vpop.f32.mrb[3].mxu0 }
 0x118   :  { %v131_v20 = vpack.c.bf16 %v130_v18, %v130_v18 }
 0x11a   :  { %310 = vmatmul.mubr.bf16.vlgmr.msra.gmra.mrb[0].mxu1 %v131_v20 }
 0x1ed   :  { %v237_v22 = vpop.f32.mrb[0].mxu1 }
 0x1ee   :  { %v238_v23 = vadd.f32 %v264_v21, %v237_v22  ;;  %v311_v24 = vpop.f32.mrb[1].mxu1 }
 0x1ef   :  { %v240_v25 = vpop.f32.mrb[2].mxu1 }
 0x1f0   :  { %243 = vst [vmem:[#allocation8] sm:$0xff] %v238_v23  ;;  %v312_v26 = vpop.f32.mrb[3].mxu1 }
 0x1f1   :  { %408 = shalt.err (!%p405_p0)
}
 0x1f2   :  { %s409_s4 = scalar_lea.hbm %s528_s5, 128 }
 0x1f3   :  { %p410_p1 = scmp.ne.s32.totalorder %s528_s5, %s409_s4  ;;  %p413_p2 = scmp.lt.u32.totalorder %s409_s4, %s528_s5 }
 0x1f5   :  { %p415_p3 = pnand %p413_p2, %p410_p1 }
 0x1f7   :  { %418 = shalt.err (!%p415_p3)
}
 0x1f8   :  { %253 = dma.vmem_to_hbm [thread:$0]  %s251_s8, 128, %s528_s5, [#allocation4]  }
 0x1f9   :  { %423 = dma.done.wait [#allocation4], 128  }
 0x1fa   :  { %424 = vsyncadd [#allocation4], 4294967168 }
 0x1fb   :  { %257 = vsyncpa [#allocation3], 1 }
 0x1fc   :  { %258 = vsyncpa [#allocation6], 1 }
 0x1fd   :  { %259 = vsyncpa [#allocation4], 1 }

</bundles_post_ra>
